<compile_context>
chip_gen: v7x
topology: tpu7x:2x2x1
jax: 0.10.0
libtpu: 0.0.40
codegen_flags: <defaults>
</compile_context>

<pallas_src>
import jax
import jax.numpy as jnp
from jax.experimental import pallas as pl
from jax.experimental.pallas import tpu as pltpu


# ---------------------------------------------------------------------------
# Kernel
# ---------------------------------------------------------------------------
def encoder_kernel(x_ref, w1_ref, b1_ref, w2_ref, b2_ref,
                   wm_ref, bm_ref, wv_ref, bv_ref,
                   mean_ref, logvar_ref):
    # f32 -> bf16 cast happens in-kernel (x is read from HBM exactly once).
    x = x_ref[...].astype(w1_ref.dtype)

    # Linear1 + ReLU : (TILE_B, input_dim) @ (input_dim, 128)
    h1 = jnp.dot(x, w1_ref[...], preferred_element_type=jnp.float32)
    h1 = jnp.maximum(h1 + b1_ref[...], 0.0).astype(w2_ref.dtype)

    # Linear2 + ReLU : (TILE_B, 128) @ (128, 64)
    h2 = jnp.dot(h1, w2_ref[...], preferred_element_type=jnp.float32)
    h2 = jnp.maximum(h2 + b2_ref[...], 0.0).astype(wm_ref.dtype)

    # Heads : (TILE_B, 64) @ (64, latent) — written directly, no wrapper slices.
    zm = jnp.dot(h2, wm_ref[...], preferred_element_type=jnp.float32)
    mean_ref[...] = (zm + bm_ref[...]).astype(mean_ref.dtype)

    zv = jnp.dot(h2, wv_ref[...], preferred_element_type=jnp.float32)
    logvar_ref[...] = (zv + bv_ref[...]).astype(logvar_ref.dtype)


# ---------------------------------------------------------------------------
# Tile-size selection
# ---------------------------------------------------------------------------
def _tile_cap_from_vmem(input_dim, latent_dim, vmem_budget_bytes=8 << 20):
    """Largest batch-tile (rows) whose double-buffered working set fits budget."""
    per_row = (input_dim * 4 * 2          # f32 x tile, double-buffered
               + 2 * latent_dim * 4 * 2   # f32 mean+logvar tiles, double-buffered
               + (128 + 64 + 128) * 4)    # h1/h2 temps + slack
    cap = vmem_budget_bytes // per_row
    return int(max(8, min(8192, (cap // 8) * 8)))


def _choose_tile_b(B, cap):
    """Pick tile_b: multiple of 8 (or full B), divides B if possible, >=2 tiles
    when B splits evenly (keeps both v7x TensorCores busy)."""
    cap = max(8, (cap // 8) * 8)
    if B <= cap:
        if B >= 16 and B % 16 == 0:
            return B // 2            # exactly 2 grid steps, no padding
        return B                     # single full-extent tile, no padding
    # B > cap: largest multiple-of-8 divisor of B that fits the cap.
    for t in range(cap, 7, -8):
        if B % t == 0:
            return t
    return cap                       # fallback: ragged last tile -> pad


# ---------------------------------------------------------------------------
# Params
# ---------------------------------------------------------------------------
def init_params(key, input_dim, latent_dim):
    """PyTorch-Linear-style init, weights pre-transposed to (in, out), f32."""
    ks = jax.random.split(key, 8)

    def linear(kw, kb, fan_in, fan_out):
        bound = 1.0 / jnp.sqrt(fan_in)
        w = jax.random.uniform(kw, (fan_in, fan_out), jnp.float32, -bound, bound)
        b = jax.random.uniform(kb, (1, fan_out), jnp.float32, -bound, bound)
        return w, b

    w1, b1 = linear(ks[0], ks[1], input_dim, 128)
    w2, b2 = linear(ks[2], ks[3], 128, 64)
    wm, bm = linear(ks[4], ks[5], 64, latent_dim)
    wv, bv = linear(ks[6], ks[7], 64, latent_dim)
    return {"w1": w1, "b1": b1, "w2": w2, "b2": b2,
            "wm": wm, "bm": bm, "wv": wv, "bv": bv}


def prepare_params(params, compute_dtype=jnp.bfloat16):
    """One-time cast of weights to bf16 (biases stay f32). Call once, reuse."""
    out = {}
    for k, v in params.items():
        out[k] = v.astype(compute_dtype if k.startswith("w") else jnp.float32)
    return out


# ---------------------------------------------------------------------------
# Wrapper
# ---------------------------------------------------------------------------
def encoder_forward(x, prepared, *, vmem_budget_bytes=8 << 20):
    """x: (B, input_dim) f32. prepared: output of prepare_params().

    Returns (z_mean, z_logvar), each (B, latent_dim) f32.
    """
    B, input_dim = x.shape
    latent_dim = prepared["wm"].shape[1]
    w1, b1 = prepared["w1"], prepared["b1"]
    w2, b2 = prepared["w2"], prepared["b2"]
    wm, bm = prepared["wm"], prepared["bm"]
    wv, bv = prepared["wv"], prepared["bv"]
    h1_dim, h2_dim = w1.shape[1], w2.shape[1]

    cap = _tile_cap_from_vmem(input_dim, latent_dim, vmem_budget_bytes)
    tile_b = _choose_tile_b(B, cap)
    n_tiles = pl.cdiv(B, tile_b)
    b_pad = n_tiles * tile_b

    x_in = x
    if b_pad != B:                    # fallback only (tile_b normally divides B)
        x_in = jnp.pad(x, ((0, b_pad - B), (0, 0)))

    resident = lambda shape: pl.BlockSpec(shape, lambda i: (0, 0))

    flops = 2 * b_pad * (input_dim * h1_dim + h1_dim * h2_dim
                         + 2 * h2_dim * latent_dim)
    bytes_accessed = (
        x_in.size * x_in.dtype.itemsize
        + sum(a.size * a.dtype.itemsize for a in (w1, b1, w2, b2, wm, bm, wv, bv))
        + 2 * b_pad * latent_dim * 4)

    z_mean, z_logvar = pl.pallas_call(
        encoder_kernel,
        out_shape=(jax.ShapeDtypeStruct((b_pad, latent_dim), jnp.float32),
                   jax.ShapeDtypeStruct((b_pad, latent_dim), jnp.float32)),
        grid=(n_tiles,),
        in_specs=[
            pl.BlockSpec((tile_b, input_dim), lambda i: (i, 0)),   # x tile (f32)
            resident(w1.shape), resident(b1.shape),
            resident(w2.shape), resident(b2.shape),
            resident(wm.shape), resident(bm.shape),
            resident(wv.shape), resident(bv.shape),
        ],
        out_specs=(pl.BlockSpec((tile_b, latent_dim), lambda i: (i, 0)),
                   pl.BlockSpec((tile_b, latent_dim), lambda i: (i, 0))),
        compiler_params=pltpu.CompilerParams(
            dimension_semantics=("parallel",),
            vmem_limit_bytes=32 * 1024 * 1024),
        cost_estimate=pl.CostEstimate(
            flops=flops, transcendentals=0, bytes_accessed=bytes_accessed),
    )(x_in, w1, b1, w2, b2, wm, bm, wv, bv)

    if b_pad != B:
        z_mean, z_logvar = z_mean[:B], z_logvar[:B]
    return z_mean, z_logvar


# ---------------------------------------------------------------------------
# Pure-JAX reference (same bf16-in / f32-accumulate math as the kernel)
# ---------------------------------------------------------------------------
def reference_forward(x, p, compute_dtype=jnp.bfloat16):
    cd = compute_dtype
    h1 = jnp.maximum(
        jnp.dot(x.astype(cd), p["w1"].astype(cd),
                preferred_element_type=jnp.float32) + p["b1"], 0.0).astype(cd)
    h2 = jnp.maximum(
        jnp.dot(h1, p["w2"].astype(cd),
                preferred_element_type=jnp.float32) + p["b2"], 0.0).astype(cd)
    z_mean = jnp.dot(h2, p["wm"].astype(cd),
                     preferred_element_type=jnp.float32) + p["bm"]
    z_logvar = jnp.dot(h2, p["wv"].astype(cd),
                       preferred_element_type=jnp.float32) + p["bv"]
    return z_mean, z_logvar


# ---------------------------------------------------------------------------
# Test
# ---------------------------------------------------------------------------
if __name__ == "__main__":
    key = jax.random.PRNGKey(0)
    k_x, k_p = jax.random.split(key)

    # Small, aligned shapes; B splits into 2 tiles -> pipelined grid, both TCs.
    B, input_dim, latent_dim = 256, 256, 64

    x = jax.random.normal(k_x, (B, input_dim), dtype=jnp.float32)
    params = init_params(k_p, input_dim, latent_dim)
    prepared = prepare_params(params)          # one-time bf16 weight cast

    z_mean, z_logvar = encoder_forward(x, prepared)
    jax.block_until_ready((z_mean, z_logvar))

    # Correctness check against plain-JAX reference (same bf16/f32 math).
    ref_mean, ref_logvar = reference_forward(x, params)
    assert z_mean.shape == (B, latent_dim) and z_logvar.shape == (B, latent_dim)
    assert jnp.allclose(z_mean, ref_mean, atol=1e-3, rtol=1e-3)
    assert jnp.allclose(z_logvar, ref_logvar, atol=1e-3, rtol=1e-3)

    print("KERNEL_OK")
</pallas_src>

<mosaic_0001>
module attributes {stable_mosaic.version = 11 : i64} {
  func.func @encoder_kernel(%arg0: i32, %arg1: memref<128x256xf32, #tpu.memory_space<vmem>>, %arg2: memref<256x128xbf16, #tpu.memory_space<vmem>>, %arg3: memref<1x128xf32, #tpu.memory_space<vmem>>, %arg4: memref<128x64xbf16, #tpu.memory_space<vmem>>, %arg5: memref<1x64xf32, #tpu.memory_space<vmem>>, %arg6: memref<64x64xbf16, #tpu.memory_space<vmem>>, %arg7: memref<1x64xf32, #tpu.memory_space<vmem>>, %arg8: memref<64x64xbf16, #tpu.memory_space<vmem>>, %arg9: memref<1x64xf32, #tpu.memory_space<vmem>>, %arg10: memref<128x64xf32, #tpu.memory_space<vmem>>, %arg11: memref<128x64xf32, #tpu.memory_space<vmem>>) attributes {dimension_semantics = [#tpu.dimension_semantics<parallel>], iteration_bounds = array<i64: 2>, scalar_prefetch = 0 : i64, scratch_operands = 0 : i64, tpu.core_type = #tpu.core_type<tc>, window_params = [{transform_indices = @transform_0, window_bounds = array<i64: 128, 256>}, {pipeline_mode = #tpu.pipeline_mode<synchronous>, transform_indices = @transform_1, window_bounds = array<i64: 256, 128>}, {pipeline_mode = #tpu.pipeline_mode<synchronous>, transform_indices = @transform_2, window_bounds = array<i64: 1, 128>}, {pipeline_mode = #tpu.pipeline_mode<synchronous>, transform_indices = @transform_3, window_bounds = array<i64: 128, 64>}, {pipeline_mode = #tpu.pipeline_mode<synchronous>, transform_indices = @transform_4, window_bounds = array<i64: 1, 64>}, {pipeline_mode = #tpu.pipeline_mode<synchronous>, transform_indices = @transform_5, window_bounds = array<i64: 64, 64>}, {pipeline_mode = #tpu.pipeline_mode<synchronous>, transform_indices = @transform_6, window_bounds = array<i64: 1, 64>}, {pipeline_mode = #tpu.pipeline_mode<synchronous>, transform_indices = @transform_7, window_bounds = array<i64: 64, 64>}, {pipeline_mode = #tpu.pipeline_mode<synchronous>, transform_indices = @transform_8, window_bounds = array<i64: 1, 64>}, {transform_indices = @transform_9, window_bounds = array<i64: 128, 64>}, {transform_indices = @transform_10, window_bounds = array<i64: 128, 64>}]} {
    %c0 = arith.constant 0 : index
    %c0_0 = arith.constant 0 : index
    %0 = vector.load %arg1[%c0, %c0_0] : memref<128x256xf32, #tpu.memory_space<vmem>>, vector<128x256xf32>
    %1 = arith.truncf %0 : vector<128x256xf32> to vector<128x256xbf16>
    %c0_1 = arith.constant 0 : index
    %c0_2 = arith.constant 0 : index
    %2 = vector.load %arg2[%c0_1, %c0_2] : memref<256x128xbf16, #tpu.memory_space<vmem>>, vector<256x128xbf16>
    %cst = arith.constant dense<0.000000e+00> : vector<128x128xf32>
    %3 = tpu.matmul %1, %2, %cst {dimension_numbers = #tpu.dot_dimension_numbers<[1], [0], [0], [1], [0, 0, 1, 1], [], []>} : vector<128x256xbf16>, vector<256x128xbf16>, vector<128x128xf32> -> vector<128x128xf32>
    %c0_3 = arith.constant 0 : index
    %c0_4 = arith.constant 0 : index
    %4 = vector.load %arg3[%c0_3, %c0_4] : memref<1x128xf32, #tpu.memory_space<vmem>>, vector<1x128xf32>
    %5 = vector.broadcast %4 : vector<1x128xf32> to vector<128x128xf32>
    %6 = arith.addf %3, %5 : vector<128x128xf32>
    %cst_5 = arith.constant 0.000000e+00 : f32
    %7 = vector.broadcast %cst_5 : f32 to vector<128x128xf32>
    %8 = arith.maximumf %6, %7 : vector<128x128xf32>
    %9 = arith.truncf %8 : vector<128x128xf32> to vector<128x128xbf16>
    %c0_6 = arith.constant 0 : index
    %c0_7 = arith.constant 0 : index
    %10 = vector.load %arg4[%c0_6, %c0_7] : memref<128x64xbf16, #tpu.memory_space<vmem>>, vector<128x64xbf16>
    %cst_8 = arith.constant dense<0.000000e+00> : vector<128x64xf32>
    %11 = tpu.matmul %9, %10, %cst_8 {dimension_numbers = #tpu.dot_dimension_numbers<[1], [0], [0], [1], [0, 0, 1, 1], [], []>} : vector<128x128xbf16>, vector<128x64xbf16>, vector<128x64xf32> -> vector<128x64xf32>
    %c0_9 = arith.constant 0 : index
    %c0_10 = arith.constant 0 : index
    %12 = vector.load %arg5[%c0_9, %c0_10] : memref<1x64xf32, #tpu.memory_space<vmem>>, vector<1x64xf32>
    %13 = vector.broadcast %12 : vector<1x64xf32> to vector<128x64xf32>
    %14 = arith.addf %11, %13 : vector<128x64xf32>
    %cst_11 = arith.constant 0.000000e+00 : f32
    %15 = vector.broadcast %cst_11 : f32 to vector<128x64xf32>
    %16 = arith.maximumf %14, %15 : vector<128x64xf32>
    %17 = arith.truncf %16 : vector<128x64xf32> to vector<128x64xbf16>
    %c0_12 = arith.constant 0 : index
    %c0_13 = arith.constant 0 : index
    %18 = vector.load %arg6[%c0_12, %c0_13] : memref<64x64xbf16, #tpu.memory_space<vmem>>, vector<64x64xbf16>
    %cst_14 = arith.constant dense<0.000000e+00> : vector<128x64xf32>
    %19 = tpu.matmul %17, %18, %cst_14 {dimension_numbers = #tpu.dot_dimension_numbers<[1], [0], [0], [1], [0, 0, 1, 1], [], []>} : vector<128x64xbf16>, vector<64x64xbf16>, vector<128x64xf32> -> vector<128x64xf32>
    %c0_15 = arith.constant 0 : index
    %c0_16 = arith.constant 0 : index
    %20 = vector.load %arg7[%c0_15, %c0_16] : memref<1x64xf32, #tpu.memory_space<vmem>>, vector<1x64xf32>
    %21 = vector.broadcast %20 : vector<1x64xf32> to vector<128x64xf32>
    %22 = arith.addf %19, %21 : vector<128x64xf32>
    %c0_17 = arith.constant 0 : index
    %c0_18 = arith.constant 0 : index
    %23 = vector.load %arg10[%c0_17, %c0_18] : memref<128x64xf32, #tpu.memory_space<vmem>>, vector<128x64xf32>
    tpu.vector_store %arg10[%c0_17, %c0_18], %22 {strides = array<i32>} : memref<128x64xf32, #tpu.memory_space<vmem>>, vector<128x64xf32>,
    %c0_19 = arith.constant 0 : index
    %c0_20 = arith.constant 0 : index
    %24 = vector.load %arg8[%c0_19, %c0_20] : memref<64x64xbf16, #tpu.memory_space<vmem>>, vector<64x64xbf16>
    %cst_21 = arith.constant dense<0.000000e+00> : vector<128x64xf32>
    %25 = tpu.matmul %17, %24, %cst_21 {dimension_numbers = #tpu.dot_dimension_numbers<[1], [0], [0], [1], [0, 0, 1, 1], [], []>} : vector<128x64xbf16>, vector<64x64xbf16>, vector<128x64xf32> -> vector<128x64xf32>
    %c0_22 = arith.constant 0 : index
    %c0_23 = arith.constant 0 : index
    %26 = vector.load %arg9[%c0_22, %c0_23] : memref<1x64xf32, #tpu.memory_space<vmem>>, vector<1x64xf32>
    %27 = vector.broadcast %26 : vector<1x64xf32> to vector<128x64xf32>
    %28 = arith.addf %25, %27 : vector<128x64xf32>
    %c0_24 = arith.constant 0 : index
    %c0_25 = arith.constant 0 : index
    %29 = vector.load %arg11[%c0_24, %c0_25] : memref<128x64xf32, #tpu.memory_space<vmem>>, vector<128x64xf32>
    tpu.vector_store %arg11[%c0_24, %c0_25], %28 {strides = array<i32>} : memref<128x64xf32, #tpu.memory_space<vmem>>, vector<128x64xf32>,
    return
  }
  func.func @transform_0(%arg0: i32) -> (i32, i32) {
    %c0_i32 = arith.constant 0 : i32
    %c0_i32_0 = arith.constant 0 : i32
    return %arg0, %c0_i32 : i32, i32
  }
  func.func @transform_1(%arg0: i32) -> (i32, i32) {
    %c0_i32 = arith.constant 0 : i32
    %c0_i32_0 = arith.constant 0 : i32
    %c0_i32_1 = arith.constant 0 : i32
    return %c0_i32, %c0_i32_0 : i32, i32
  }
  func.func @transform_2(%arg0: i32) -> (i32, i32) {
    %c0_i32 = arith.constant 0 : i32
    %c0_i32_0 = arith.constant 0 : i32
    %c0_i32_1 = arith.constant 0 : i32
    return %c0_i32, %c0_i32_0 : i32, i32
  }
  func.func @transform_3(%arg0: i32) -> (i32, i32) {
    %c0_i32 = arith.constant 0 : i32
    %c0_i32_0 = arith.constant 0 : i32
    %c0_i32_1 = arith.constant 0 : i32
    return %c0_i32, %c0_i32_0 : i32, i32
  }
  func.func @transform_4(%arg0: i32) -> (i32, i32) {
    %c0_i32 = arith.constant 0 : i32
    %c0_i32_0 = arith.constant 0 : i32
    %c0_i32_1 = arith.constant 0 : i32
    return %c0_i32, %c0_i32_0 : i32, i32
  }
  func.func @transform_5(%arg0: i32) -> (i32, i32) {
    %c0_i32 = arith.constant 0 : i32
    %c0_i32_0 = arith.constant 0 : i32
    %c0_i32_1 = arith.constant 0 : i32
    return %c0_i32, %c0_i32_0 : i32, i32
  }
  func.func @transform_6(%arg0: i32) -> (i32, i32) {
    %c0_i32 = arith.constant 0 : i32
    %c0_i32_0 = arith.constant 0 : i32
    %c0_i32_1 = arith.constant 0 : i32
    return %c0_i32, %c0_i32_0 : i32, i32
  }
  func.func @transform_7(%arg0: i32) -> (i32, i32) {
    %c0_i32 = arith.constant 0 : i32
    %c0_i32_0 = arith.constant 0 : i32
    %c0_i32_1 = arith.constant 0 : i32
    return %c0_i32, %c0_i32_0 : i32, i32
  }
  func.func @transform_8(%arg0: i32) -> (i32, i32) {
    %c0_i32 = arith.constant 0 : i32
    %c0_i32_0 = arith.constant 0 : i32
    %c0_i32_1 = arith.constant 0 : i32
    return %c0_i32, %c0_i32_0 : i32, i32
  }
  func.func @transform_9(%arg0: i32) -> (i32, i32) {
    %c0_i32 = arith.constant 0 : i32
    %c0_i32_0 = arith.constant 0 : i32
    return %arg0, %c0_i32 : i32, i32
  }
  func.func @transform_10(%arg0: i32) -> (i32, i32) {
    %c0_i32 = arith.constant 0 : i32
    %c0_i32_0 = arith.constant 0 : i32
    return %arg0, %c0_i32 : i32, i32
  }
}

</mosaic_0001>

<bundles_post_ra>
// kernel: tpu_custom_call.1
= control target key start
LH: loop header
LB: loop body
LE: loop exit
PB: predicated region body
PF: predicated region fallthrough
CT: control target
= control target key end

     0   :  { %s2268_s0 = inlined_call_operand.hbm [shape: f32[256,256], index: 0, kind: input, shape index: {}]   ;;  %s2269_s1 = inlined_call_operand.hbm [shape: bf16[256,128], index: 1, kind: input, shape index: {}]   ;;  %s2270_s2 = inlined_call_operand.vmem [shape: f32[1,128], index: 2, kind: input, shape index: {}]   ;;  %s2271_s3 = inlined_call_operand.vmem [shape: bf16[128,64], index: 3, kind: input, shape index: {}]   ;;  %s2272_s4 = inlined_call_operand.vmem [shape: f32[1,64], index: 4, kind: input, shape index: {}]   ;;  %s2273_s5 = inlined_call_operand.vmem [shape: bf16[64,64], index: 5, kind: input, shape index: {}]   ;;  %s2274_s6 = inlined_call_operand.vmem [shape: f32[1,64], index: 6, kind: input, shape index: {}]   ;;  %s2275_s7 = inlined_call_operand.vmem [shape: bf16[64,64], index: 7, kind: input, shape index: {}]   ;;  %s2276_s8 = inlined_call_operand.vmem [shape: f32[1,64], index: 8, kind: input, shape index: {}]   ;;  %s2277_s9 = inlined_call_operand.vmem [shape: f32[256,64], index: 9, kind: output, shape index: {0}]   ;;  %s2278_s10 = inlined_call_operand.vmem [shape: f32[256,64], index: 10, kind: output, shape index: {1}]  }
   0x1   :  { %2286 = sst [smem:[#allocation9_spill]] %s2278_s10 }
   0x2   :  { %16 = vsyncpa [#allocation3], 0 }
   0x3   :  { %18 = vsyncpa [#allocation3 + $0x1], 0 }
   0x4   :  { %19 = vsyncpa [#allocation5], 0  ;;  %s1858_s13 = smov 0   ;;  %s1860_s14 = smov 0  }
   0x5   :  { %s1862_s15 = smov 0   ;;  %s1864_s16 = smov 0  }
   0x6 LB: > { %s2283_s17 = sadd.s32 4294967295, %s1795_s16   ;;  %p45_p0 = scmp.ne.s32.totalorder %s1787_s14, %s1783_s13  ;;  %s1795_s16 = sphi %s1864_s16, %s2298_s16   ;;  %s1791_s15 = sphi %s1862_s15, %s2301_s15   ;;  %s1787_s14 = sphi %s1860_s14, %s2300_s14   ;;  %s1783_s13 = sphi %s1858_s13, %s2299_s13  }
   0x7   : > { %p1880_p1 = scmp.eq.s32.totalorder %s2283_s17, 0  ;;  %p1351_p2 = scmp.ge.s32.totalorder %s1795_s16, 1 }
   0x8   : > { %p276_p3 = scmp.lt.s32.totalorder %s1795_s16, 3  ;;  %s1797_s21 = smov [#allocation4]  }
   0x9   : > { %s2287_s18 = scalar_select %p1880_p1, 1, 0 }
   0xa   : > { %p1888_p4 = por %p1880_p1, %p45_p0  ;;  %p1892_p5 = pnand %p1351_p2, %p276_p3 }
   0xb   : > { %s288_s22 = sshll.u32 %s1797_s21, 4  ;;  %s1905_s24 = sadd.s32 1, %s1795_s16   ;;  %s289_s22 = int_to_ptr.vmem [resolvable:$true] %s288_s22 }
   0xc   : > { %s2288_s19 = scalar_select %p1888_p4, 1, 0 }
   0xd   : > { %s2289_s20 = scalar_select %p1892_p5, 1, 0 }
   0xe   : > { %p1619_p6 = pneg %p1892_p5  ;;  %2291 = sst [smem:[#allocation8_spill]] %s1905_s24 }
   0xf   : > { %s32_s25 = sadd.s32 1, %s1791_s15  ;;  %s29_s26 = ssub.s32 %s1795_s16, %s1905_s24 }
  0x10   : > { %p1900_p7 = pnand %p1619_p6, %p1880_p1  ;;  %s1699_s29 = scalar_lea.hbm %s2269_s1, 2048 }
  0x11   : > { %p1700_p8 = scmp.ne.s32.totalorder %s2269_s1, %s1699_s29  ;;  %p1706_p12 = scmp.lt.u32.totalorder %s1699_s29, %s2269_s1 }
  0x12   : > { %p1701_p9 = pneg %p1900_p7 }
  0x14   : > { %p1702_p10 = pnand %p1701_p9, %p1700_p8 }
  0x16   : > { %p1703_p11 = pneg %p1702_p10 }
  0x18   : > { %p1708_p13 = pnand %p1706_p12, %p1703_p11 }
  0x1a   : > { %1711 = shalt.err (!%p1708_p13)
}
  0x1b   : > { %s1712_s21 = scalar_lea.vmem %s289_s22, 2048  ;;  %p1720_p6 = scmp.lt.s32.totalorder %s289_s22, %s289_s22 }
  0x1c   : > { %p1713_p0 = scmp.ne.s32.totalorder %s289_s22, %s1712_s21  ;;  %p1721_p1 = scmp.lt.s32.totalorder %s1712_s21, %s1712_s21 }
  0x1e   : > { %p1715_p2 = pnand %p1713_p0, %p1701_p9  ;;  %p1722_p4 = por %p1721_p1, %p1720_p6 }
  0x20   : > { %p1716_p3 = pneg %p1715_p2 }
  0x22   : > { %p1723_p5 = pnand %p1722_p4, %p1716_p3 }
  0x24   : > { %1726 = shalt.err (!%p1723_p5)
}
  0x25   : > { %s1798_s27 = smov 64   ;;  %s1799_s28 = smov 4  }
  0x26   : > { %1622 = dma.hbm_to_vmem [thread:$0]  (!%p1900_p7), %s2269_s1, 2048, %s289_s22, [#allocation5], %s1798_s27, %s1798_s27, %s1799_s28  }
  0x27   : > { %p30_p8 = scmp.eq.s32.totalorder %s29_s26, 0  ;;  %p39_p9 = scmp.ne.s32.totalorder %s1791_s15, %s1787_s14 }
  0x28   : > { %p40_p1 = scmp.eq.s32.totalorder %s1795_s16, 0  ;;  %p1628_p4 = scmp.lt.s32.totalorder %s1795_s16, 2 }
  0x29   : > { %s1931_s11 = scalar_select %p30_p8, %s1791_s15, %s32_s25  }
  0x2a   : > { %p41_p5 = por %p40_p1, %p39_p9  ;;  %s323_s12 = sand.u32 1, %s1791_s15  }
  0x2b   : > { %s1354_s13 = sshll.u32 %s323_s12, 8  ;;  %s1420_s21 = sshll.u32 %s1795_s16, 12 }
  0x2c   : > { %s1938_s10 = scalar_lea.hbm %s2268_s0, %s1420_s21  ;;  %s327_s22 = scalar_lea.vmem [#allocation2], %s1354_s13 }
  0x2d   : > { %s335_s23 = sshll.u32 %s327_s22, 4  ;;  %p1942_p7 = pnand %p1628_p4, %p41_p5  ;;  %s1940_s23 = int_to_ptr.vmem [resolvable:$true] %s335_s23 }
  0x2e   : > { %s1946_s26 = scalar_lea.sflag [#allocation3], %s323_s12  ;;  %s1727_s27 = scalar_lea.hbm %s1938_s10, 4096 }
  0x2f   : > { %p1728_p10 = scmp.ne.s32.totalorder %s1938_s10, %s1727_s27  ;;  %p1729_p11 = pneg %p1942_p7 }
  0x30   : > { %s1732_s28 = scalar_lea.hbm %s2268_s0, 8192  ;;  %p1733_p0 = scmp.lt.u32.totalorder %s1938_s10, %s2268_s0 }
  0x31   : > { %p1730_p12 = pnand %p1729_p11, %p1728_p10  ;;  %p1734_p2 = scmp.lt.u32.totalorder %s1732_s28, %s1727_s27 }
  0x32   : > { %p1736_p6 = scmp.lt.u32.totalorder %s1727_s27, %s1938_s10 }
  0x33   : > { %p1731_p13 = pneg %p1730_p12  ;;  %p1735_p3 = por %p1734_p2, %p1733_p0 }
  0x35   : > { %p1737_p8 = por %p1736_p6, %p1735_p3 }
  0x37   : > { %p1738_p9 = pnand %p1737_p8, %p1731_p13 }
  0x39   : > { %1741 = shalt.err (!%p1738_p9)
}
  0x3a   : > { %s1742_s12 = scalar_lea.vmem %s1940_s23, 4096  ;;  %s1800_s13 = smov [#allocation2]  }
  0x3b   : > { %p1743_p1 = scmp.ne.s32.totalorder %s1940_s23, %s1742_s12  ;;  %s1747_s21 = sshll.u32 %s1800_s13, 4  ;;  %s1748_s21 = int_to_ptr.vmem [resolvable:$false] %s1747_s21 }
  0x3c   : > { %s1749_s22 = scalar_lea.vmem %s1748_s21, 8192  ;;  %p1750_p10 = scmp.lt.s32.totalorder %s1940_s23, %s1748_s21 }
  0x3d   : > { %p1745_p4 = pnand %p1743_p1, %p1729_p11  ;;  %p1751_p12 = scmp.lt.s32.totalorder %s1749_s22, %s1742_s12 }
  0x3f   : > { %p1746_p5 = pneg %p1745_p4  ;;  %p1752_p0 = por %p1751_p12, %p1750_p10 }
  0x41   : > { %p1753_p2 = pnand %p1752_p0, %p1746_p5 }
  0x43   : > { %1756 = shalt.err (!%p1753_p2)
}
  0x44   : > { %s1801_s27 = smov 256   ;;  %s1802_s17 = smov 16  }
  0x45   : > { %1626 = dma.hbm_to_vmem [thread:$0]  (!%p1942_p7), %s1938_s10, 4096, %s1940_s23, %s1946_s26, %s1801_s27, %s1801_s27, %s1802_s17  }
  0x46   : > { %p2293_p11 = scmp.ne.s32.totalorder %s2289_s20, 0 }
  0x47   : > { %s349_s24 = sand.u32 (!%p2293_p11), 1, %s1787_s14   ;;  %p2294_p13 = scmp.ne.s32.totalorder (!%p2293_p11), %s2288_s19, 0 }
  0x48   : > { %347 = sbr.rel (%p2293_p11) target bundleno = 851 (0x353), region = 56  ;;  %s1359_s28 = sshll.u32 (!%p2293_p11), %s349_s24, 8 }
  0x49   : > { %s350_s29 = scalar_lea.sflag (!%p2293_p11), [#allocation3], %s349_s24  ;;  %s1977_s30 = scalar_lea.vmem (!%p2293_p11), [#allocation2], %s1359_s28 }
  0x4f   : > { %1774 = dma.done.wait (%p2294_p13), %s350_s29, 4096  }
  0x50   : > { %1776 = vsyncadd (%p2294_p13), %s350_s29, 4294963200  ;;  %p2295_p3 = scmp.ne.s32.totalorder %s2287_s18, 0 }
  0x52   : > { %1778 = dma.done.wait (%p2295_p3), [#allocation5], 2048  }
  0x53   : > { %1780 = vsyncadd (%p2295_p3), [#allocation5], 4294965248  ;;  %v1667_v0 = vld [vmem:[#allocation4 + $0x40] sm:$0xff]   ;;  %v1669_v2 = vld [vmem:[#allocation4 + $0x48] sm:$0xff]   ;;  %vm948_vm0 = vcmask 523264   ;;  %s2296_s19 = sadd.s32 4294967295, %s1795_s16  }
  0x54   : > { %v1668_v1 = vld [vmem:[#allocation4] sm:$0xff]   ;;  %1421 = vmatprep.subr.bf16.mxu0 %v1667_v0  ;;  %v1670_v3 = vld [vmem:[#allocation4 + $0x8] sm:$0xff]   ;;  %v1671_v4 = vld [vmem:[#allocation4 + $0x50] sm:$0xff]   ;;  %s1361_s20 = sshll.u32 %s2296_s19, 4  ;;  %s2297_s24 = sld [smem:[#allocation9_spill]] }
  0x55   : > { %1422 = vmatpush3.bf16.msra.mxu0 %v1668_v1  ;;  %v1672_v5 = vld [vmem:[#allocation4 + $0x10] sm:$0xff]   ;;  %v1673_v6 = vld [vmem:[#allocation4 + $0x58] sm:$0xff]   ;;  %v1675_v8 = vld [vmem:[#allocation4 + $0x60] sm:$0xff]   ;;  %p401_p7 = scmp.lt.s32.totalorder %s1361_s20, 31 }
  0x56   : > { %1423 = vmatprep.subr.bf16.mxu0 %v1669_v2  ;;  %v1674_v7 = vld [vmem:[#allocation4 + $0x18] sm:$0xff]   ;;  %v1676_v9 = vld [vmem:[#allocation4 + $0x20] sm:$0xff]   ;;  %v1677_v10 = vld [vmem:[#allocation4 + $0x68] sm:$0xff]  }
  0x57   : > { %v414_v11 = vld [vmem:[%s1977_s30 + $0x8] sm:$0xff]  ;;  %v416_v12 = vld [vmem:[%s1977_s30 + $0x18] sm:$0xff]  ;;  %v1679_v15 = vld [vmem:[#allocation4 + $0x70] sm:$0xff]   ;;  %s2303_s20 = smov (!%p401_p7, %s1361_s20), 31 }
  0x58   : > { %v446_v13 = vpack.c.bf16 %v416_v12, %v414_v11  ;;  %v1678_v14 = vld [vmem:[#allocation4 + $0x28] sm:$0xff]   ;;  %v1680_v16 = vld [vmem:[#allocation4 + $0x30] sm:$0xff]   ;;  %v1681_v17 = vld [vmem:[#allocation4 + $0x78] sm:$0xff]   ;;  %s1362_s23 = sshll.u32 %s2303_s20, 3 }
  0x59   : > { %1424 = vmatpush3.bf16.msra.mxu0 %v1670_v3  ;;  %v1682_v18 = vld [vmem:[#allocation4 + $0x38] sm:$0xff]   ;;  %v413_v19 = vld [vmem:[%s1977_s30] sm:$0xff]  ;;  %v415_v20 = vld [vmem:[%s1977_s30 + $0x10] sm:$0xff]  ;;  %s2152_s27 = scalar_lea.vmem %s2277_s9, %s1362_s23 }
  0x5a   : > { %1425 = vmatprep.subr.bf16.mxu0 %v1671_v4  ;;  %628 = vmatprep.mubr.bf16.mxu0 %v446_v13  ;;  %v418_v21 = vld [vmem:[%s1977_s30 + $0x28] sm:$0xff]  ;;  %v420_v22 = vld [vmem:[%s1977_s30 + $0x38] sm:$0xff]  ;;  %v1683_v23 = vld [vmem:[%s2271_s3] sm:$0xff]   ;;  %v445_v26 = vpack.c.bf16 %v415_v20, %v413_v19  ;;  %s2157_s28 = scalar_lea.vmem %s2297_s24, %s1362_s23 }
  0x5b   : > { %v1684_v24 = vld [vmem:[%s2271_s3 + $0x8] sm:$0xff]   ;;  %1525 = vmatprep.subr.bf16.mxu1 %v1683_v23  ;;  %v1685_v25 = vld [vmem:[%s2271_s3 + $0x10] sm:$0xff]   ;;  %v448_v27 = vpack.c.bf16 %v420_v22, %v418_v21  ;;  %v417_v28 = vld [vmem:[%s1977_s30 + $0x20] sm:$0xff] }
  0x5c   : > { %1526 = vmatpush3.bf16.msra.mxu1 %v1683_v23  ;;  %v419_v29 = vld [vmem:[%s1977_s30 + $0x30] sm:$0xff]  ;;  %v422_v30 = vld [vmem:[%s1977_s30 + $0x48] sm:$0xff]  ;;  %v424_v31 = vld [vmem:[%s1977_s30 + $0x58] sm:$0xff] }
  0x5d   : > { %1426 = vmatpush3.bf16.msra.mxu0 %v1672_v5  ;;  %1527 = vmatprep.subr.bf16.mxu1 %v1684_v24  ;;  %v447_v32 = vpack.c.bf16 %v419_v29, %v417_v28  ;;  %v450_v33 = vpack.c.bf16 %v424_v31, %v422_v30  ;;  %v421_v34 = vld [vmem:[%s1977_s30 + $0x40] sm:$0xff]  ;;  %v423_v35 = vld [vmem:[%s1977_s30 + $0x50] sm:$0xff]  ;;  %v426_v36 = vld [vmem:[%s1977_s30 + $0x68] sm:$0xff] }
  0x5e   : > { %1427 = vmatprep.subr.bf16.mxu0 %v1673_v6  ;;  %v428_v37 = vld [vmem:[%s1977_s30 + $0x78] sm:$0xff]  ;;  %v449_v38 = vpack.c.bf16 %v423_v35, %v421_v34  ;;  %v425_v40 = vld [vmem:[%s1977_s30 + $0x60] sm:$0xff]  ;;  %v427_v41 = vld [vmem:[%s1977_s30 + $0x70] sm:$0xff] }
  0x5f   : > { %v452_v39 = vpack.c.bf16 %v428_v37, %v426_v36  ;;  %v430_v42 = vld [vmem:[%s1977_s30 + $0x88] sm:$0xff]  ;;  %v432_v43 = vld [vmem:[%s1977_s30 + $0x98] sm:$0xff]  ;;  %v451_v44 = vpack.c.bf16 %v427_v41, %v425_v40  ;;  %v429_v46 = vld [vmem:[%s1977_s30 + $0x80] sm:$0xff] }
  0x60   : > { %1528 = vmatpush3.bf16.msra.mxu1 %v1684_v24  ;;  %v454_v45 = vpack.c.bf16 %v432_v43, %v430_v42  ;;  %v431_v47 = vld [vmem:[%s1977_s30 + $0x90] sm:$0xff]  ;;  %v434_v48 = vld [vmem:[%s1977_s30 + $0xa8] sm:$0xff]  ;;  %v436_v49 = vld [vmem:[%s1977_s30 + $0xb8] sm:$0xff] }
  0x61   : > { %1428 = vmatpush3.bf16.msra.mxu0 %v1674_v7  ;;  %1529 = vmatprep.subr.bf16.mxu1 %v1685_v25  ;;  %v453_v50 = vpack.c.bf16 %v431_v47, %v429_v46  ;;  %v456_v51 = vpack.c.bf16 %v436_v49, %v434_v48  ;;  %v433_v52 = vld [vmem:[%s1977_s30 + $0xa0] sm:$0xff]  ;;  %v435_v53 = vld [vmem:[%s1977_s30 + $0xb0] sm:$0xff]  ;;  %v438_v54 = vld [vmem:[%s1977_s30 + $0xc8] sm:$0xff] }
  0x62   : > { %1429 = vmatprep.subr.bf16.mxu0 %v1675_v8  ;;  %v440_v55 = vld [vmem:[%s1977_s30 + $0xd8] sm:$0xff]  ;;  %v455_v56 = vpack.c.bf16 %v435_v53, %v433_v52  ;;  %v437_v58 = vld [vmem:[%s1977_s30 + $0xc0] sm:$0xff]  ;;  %v439_v59 = vld [vmem:[%s1977_s30 + $0xd0] sm:$0xff] }
  0x63   : > { %v458_v57 = vpack.c.bf16 %v440_v55, %v438_v54  ;;  %v442_v60 = vld [vmem:[%s1977_s30 + $0xe8] sm:$0xff]  ;;  %v444_v61 = vld [vmem:[%s1977_s30 + $0xf8] sm:$0xff]  ;;  %v457_v62 = vpack.c.bf16 %v439_v59, %v437_v58  ;;  %v441_v0 = vld [vmem:[%s1977_s30 + $0xe0] sm:$0xff] }
  0x64   : > { %1530 = vmatpush3.bf16.msra.mxu1 %v1685_v25  ;;  %v460_v63 = vpack.c.bf16 %v444_v61, %v442_v60  ;;  %v443_v1 = vld [vmem:[%s1977_s30 + $0xf0] sm:$0xff]  ;;  %v1686_v3 = vld [vmem:[%s2271_s3 + $0x18] sm:$0xff]   ;;  %v1687_v4 = vld [vmem:[%s2271_s3 + $0x20] sm:$0xff]  }
  0x65   : > { %1430 = vmatpush3.bf16.msra.mxu0 %v1676_v9  ;;  %v459_v2 = vpack.c.bf16 %v443_v1, %v441_v0  ;;  %1531 = vmatprep.subr.bf16.mxu1 %v1686_v3  ;;  %v1688_v5 = vld [vmem:[%s2271_s3 + $0x28] sm:$0xff]   ;;  %v1689_v6 = vld [vmem:[%s2271_s3 + $0x30] sm:$0xff]   ;;  %v1690_v7 = vld [vmem:[%s2271_s3 + $0x38] sm:$0xff]  }
  0x66   : > { %1431 = vmatprep.subr.bf16.mxu0 %v1677_v10  ;;  %v1691_v8 = vld [vmem:[%s2273_s5] sm:$0xff]   ;;  %v2054_v10 = vld [vmem:[%s2275_s7 + $0x8] sm:$0xff]  }
  0x67   : > { %v2049_v9 = vld [vmem:[%s2275_s7] sm:$0xff]  }
  0x68   : > { %1532 = vmatpush3.bf16.msra.mxu1 %v1686_v3  ;;  %v2063_v13 = vld [vmem:[%s2270_s2] ss:$0 sm:$0xff] }
  0x69   : > { %1432 = vmatpush3.bf16.msra.mxu0 %v1678_v14  ;;  %1533 = vmatprep.subr.bf16.mxu1 %v1687_v4 }
  0x6a   : > { %1433 = vmatprep.subr.bf16.mxu0 %v1679_v15 }
  0x6c   : > { %1534 = vmatpush3.bf16.msra.mxu1 %v1687_v4 }
  0x6d   : > { %1434 = vmatpush3.bf16.msra.mxu0 %v1680_v16  ;;  %1535 = vmatprep.subr.bf16.mxu1 %v1688_v5 }
  0x6e   : > { %1435 = vmatprep.subr.bf16.mxu0 %v1681_v17 }
  0x70   : > { %1536 = vmatpush3.bf16.msra.mxu1 %v1688_v5 }
  0x71   : > { %1436 = vmatpush3.bf16.msra.mxu0 %v1682_v18  ;;  %1537 = vmatprep.subr.bf16.mxu1 %v1689_v6 }
  0x72   : > { %1581 = vmatprep.subr.bf16.mxu0 %v2049_v9 }
  0x74   : > { %629 = vmatmul.mubr.bf16.vlgmr.msra.gmra.mrb[0].mxu0 %v445_v26  ;;  %1538 = vmatpush3.bf16.msra.mxu1 %v1689_v6 }
  0x75   : > { %636 = vmatprep.mubr.bf16.mxu0 %v448_v27  ;;  %1539 = vmatprep.subr.bf16.mxu1 %v1690_v7 }
  0x76   : > { %1582 = vmatpush3.bf16.msra.mxu0 %v2049_v9 }
  0x77   : > { %1583 = vmatprep.subr.bf16.mxu0 %v2054_v10 }
  0x78   : > { %1540 = vmatpush3.bf16.msra.mxu1 %v1690_v7 }
  0x79   : > { %1557 = vmatprep.subr.bf16.mxu1 %v1691_v8 }
  0x7a   : > { %1584 = vmatpush3.bf16.msra.mxu0 %v2054_v10 }
  0x7c   : > { %637 = vmatmul.mubr.bf16.gmra.mrb[4].mxu0 %v447_v32 }
  0x7d   : > { %644 = vmatprep.mubr.bf16.mxu0 %v450_v33 }
  0x84   : > { %645 = vmatmul.mubr.bf16.gmra.mrb[8].mxu0 %v449_v38  ;;  %v1693_v38 = vld [vmem:[%s2273_s5 + $0x8] sm:$0xff]  }
  0x85   : > { %652 = vmatprep.mubr.bf16.mxu0 %v452_v39 }
  0x8c   : > { %653 = vmatmul.mubr.bf16.gmra.mrb[12].mxu0 %v451_v44 }
  0x8d   : > { %660 = vmatprep.mubr.bf16.mxu0 %v454_v45 }
  0x94   : > { %661 = vmatmul.mubr.bf16.gmra.mrb[16].mxu0 %v453_v50 }
  0x95   : > { %668 = vmatprep.mubr.bf16.mxu0 %v456_v51 }
  0x9c   : > { %669 = vmatmul.mubr.bf16.gmra.mrb[20].mxu0 %v455_v56 }
  0x9d   : > { %676 = vmatprep.mubr.bf16.mxu0 %v458_v57 }
  0xa4   : > { %677 = vmatmul.mubr.bf16.gmra.mrb[24].mxu0 %v457_v62 }
  0xa5   : > { %684 = vmatprep.mubr.bf16.mxu0 %v460_v63 }
  0xac   : > { %685 = vmatmul.mubr.bf16.gmra.mrb[28].mxu0 %v459_v2 }
 0x147   : > { %v1437_v11 = vpop.f32.mrb[0].mxu0 }
 0x148   : > { %v1438_v12 = vpop.f32.mrb[1].mxu0 }
 0x149   : > { %v1439_v14 = vadd.f32 %v1438_v12, %v1437_v11  ;;  %v1440_v15 = vpop.f32.mrb[2].mxu0 }
 0x14a   : > { %v1441_v16 = vpop.f32.mrb[3].mxu0 }
 0x14b   : > { %v1442_v17 = vadd.f32 %v1441_v16, %v1440_v15  ;;  %v631_v18 = vadd.f32 %v1439_v14, %v2063_v13 }
 0x14d   : > { %v634_v19 = vadd.f32 %v1442_v17, %v2063_v13  ;;  %v693_v21 = vmax.f32 %v631_v18, 0.0 }
 0x14f   : > { %v1443_v20 = vpop.f32.mrb[4].mxu0  ;;  %v694_v22 = vmax.f32 %v634_v19, 0.0 }
 0x150   : > { %v1444_v23 = vpop.f32.mrb[5].mxu0 }
 0x151   : > { %v1445_v24 = vadd.f32 %v1444_v23, %v1443_v20  ;;  %v1446_v25 = vpop.f32.mrb[6].mxu0  ;;  %v709_v26 = vpack.c.bf16 %v694_v22, %v693_v21 }
 0x152   : > { %v1447_v27 = vpop.f32.mrb[7].mxu0 }
 0x153   : > { %v639_v28 = vadd.f32 %v1445_v24, %v2063_v13  ;;  %v1448_v29 = vadd.f32 %v1447_v27, %v1446_v25  ;;  %1541 = vmatprep.mubr.bf16.mxu1 %v709_v26 }
 0x155   : > { %v642_v30 = vadd.f32 %v1448_v29, %v2063_v13  ;;  %v695_v31 = vmax.f32 %v639_v28, 0.0 }
 0x157   : > { %v696_v32 = vmax.f32 %v642_v30, 0.0  ;;  %v1449_v33 = vpop.f32.mrb[8].mxu0 }
 0x158   : > { %v1450_v34 = vpop.f32.mrb[9].mxu0 }
 0x159   : > { %v1451_v35 = vadd.f32 %v1450_v34, %v1449_v33  ;;  %v1452_v36 = vpop.f32.mrb[10].mxu0  ;;  %v710_v37 = vpack.c.bf16 %v696_v32, %v695_v31 }
 0x15a   : > { %v1453_v39 = vpop.f32.mrb[11].mxu0 }
 0x15b   : > { %v647_v40 = vadd.f32 %v1451_v35, %v2063_v13  ;;  %v1454_v41 = vadd.f32 %v1453_v39, %v1452_v36  ;;  %1542 = vmatmul.mubr.bf16.vlgmr.msra.gmra.mrb[0].mxu1 %v710_v37 }
 0x15c   : > { %1558 = vmatpush3.bf16.msra.mxu1 %v1691_v8 }
 0x15d   : > { %v650_v42 = vadd.f32 %v1454_v41, %v2063_v13  ;;  %1559 = vmatprep.subr.bf16.mxu1 %v1693_v38  ;;  %v697_v43 = vmax.f32 %v647_v40, 0.0  ;;  %v1695_v40 = vld [vmem:[%s2273_s5 + $0x10] sm:$0xff]  }
 0x15e   : > { %v1696_v41 = vld [vmem:[%s2275_s7 + $0x10] sm:$0xff]  }
 0x15f   : > { %v698_v44 = vmax.f32 %v650_v42, 0.0  ;;  %v1455_v45 = vpop.f32.mrb[12].mxu0  ;;  %1585 = vmatprep.subr.bf16.mxu0 %v1696_v41  ;;  %v1698_v42 = vld [vmem:[%s2275_s7 + $0x18] sm:$0xff]  }
 0x160   : > { %v1456_v46 = vpop.f32.mrb[13].mxu0  ;;  %1560 = vmatpush3.bf16.msra.mxu1 %v1693_v38  ;;  %1586 = vmatpush3.bf16.msra.mxu0 %v1696_v41 }
 0x161   : > { %v1457_v47 = vadd.f32 %v1456_v46, %v1455_v45  ;;  %v1458_v48 = vpop.f32.mrb[14].mxu0  ;;  %v711_v49 = vpack.c.bf16 %v698_v44, %v697_v43  ;;  %1561 = vmatprep.subr.bf16.mxu1 %v1695_v40  ;;  %1587 = vmatprep.subr.bf16.mxu0 %v1698_v42  ;;  %v2100_v43 = vld [vmem:[%s2272_s4] ss:$0 sm:$0xff] }
 0x162   : > { %v1459_v50 = vpop.f32.mrb[15].mxu0 }
 0x163   : > { %v655_v51 = vadd.f32 %v1457_v47, %v2063_v13  ;;  %v1460_v52 = vadd.f32 %v1459_v50, %v1458_v48  ;;  %1545 = vmatprep.mubr.bf16.mxu1 %v711_v49 }
 0x164   : > { %1562 = vmatpush3.bf16.msra.mxu1 %v1695_v40  ;;  %1588 = vmatpush3.bf16.msra.mxu0 %v1698_v42 }
 0x165   : > { %v658_v53 = vadd.f32 %v1460_v52, %v2063_v13  ;;  %v699_v54 = vmax.f32 %v655_v51, 0.0 }
 0x167   : > { %v700_v55 = vmax.f32 %v658_v53, 0.0  ;;  %v1461_v56 = vpop.f32.mrb[16].mxu0 }
 0x168   : > { %v1462_v57 = vpop.f32.mrb[17].mxu0 }
 0x169   : > { %v1463_v58 = vadd.f32 %v1462_v57, %v1461_v56  ;;  %v1464_v59 = vpop.f32.mrb[18].mxu0  ;;  %v712_v60 = vpack.c.bf16 %v700_v55, %v699_v54 }
 0x16a   : > { %v1465_v61 = vpop.f32.mrb[19].mxu0 }
 0x16b   : > { %v663_v62 = vadd.f32 %v1463_v58, %v2063_v13  ;;  %v1466_v63 = vadd.f32 %v1465_v61, %v1464_v59  ;;  %1546 = vmatmul.mubr.bf16.gmra.mrb[4].mxu1 %v712_v60 }
 0x16d   : > { %v666_v0 = vadd.f32 %v1466_v63, %v2063_v13  ;;  %v701_v1 = vmax.f32 %v663_v62, 0.0 }
 0x16f   : > { %v702_v2 = vmax.f32 %v666_v0, 0.0  ;;  %v1467_v3 = vpop.f32.mrb[20].mxu0 }
 0x170   : > { %v1468_v4 = vpop.f32.mrb[21].mxu0 }
 0x171   : > { %v1469_v5 = vadd.f32 %v1468_v4, %v1467_v3  ;;  %v1470_v6 = vpop.f32.mrb[22].mxu0  ;;  %v713_v7 = vpack.c.bf16 %v702_v2, %v701_v1 }
 0x172   : > { %v1471_v8 = vpop.f32.mrb[23].mxu0 }
 0x173   : > { %v671_v11 = vadd.f32 %v1469_v5, %v2063_v13  ;;  %v1472_v12 = vadd.f32 %v1471_v8, %v1470_v6  ;;  %1549 = vmatprep.mubr.bf16.mxu1 %v713_v7 }
 0x175   : > { %v674_v14 = vadd.f32 %v1472_v12, %v2063_v13  ;;  %v703_v15 = vmax.f32 %v671_v11, 0.0 }
 0x177   : > { %v704_v16 = vmax.f32 %v674_v14, 0.0  ;;  %v1473_v17 = vpop.f32.mrb[24].mxu0 }
 0x178   : > { %v1474_v18 = vpop.f32.mrb[25].mxu0 }
 0x179   : > { %v1475_v19 = vadd.f32 %v1474_v18, %v1473_v17  ;;  %v1476_v20 = vpop.f32.mrb[26].mxu0  ;;  %v714_v21 = vpack.c.bf16 %v704_v16, %v703_v15 }
 0x17a   : > { %v1477_v22 = vpop.f32.mrb[27].mxu0 }
 0x17b   : > { %v679_v23 = vadd.f32 %v1475_v19, %v2063_v13  ;;  %v1478_v24 = vadd.f32 %v1477_v22, %v1476_v20  ;;  %1550 = vmatmul.mubr.bf16.gmra.mrb[8].mxu1 %v714_v21 }
 0x17d   : > { %v682_v25 = vadd.f32 %v1478_v24, %v2063_v13  ;;  %v705_v26 = vmax.f32 %v679_v23, 0.0 }
 0x17f   : > { %v706_v27 = vmax.f32 %v682_v25, 0.0  ;;  %v1479_v28 = vpop.f32.mrb[28].mxu0 }
 0x180   : > { %v1480_v29 = vpop.f32.mrb[29].mxu0 }
 0x181   : > { %v1481_v30 = vadd.f32 %v1480_v29, %v1479_v28  ;;  %v1482_v31 = vpop.f32.mrb[30].mxu0  ;;  %v715_v32 = vpack.c.bf16 %v706_v27, %v705_v26 }
 0x182   : > { %v1483_v33 = vpop.f32.mrb[31].mxu0 }
 0x183   : > { %v687_v34 = vadd.f32 %v1481_v30, %v2063_v13  ;;  %v1484_v35 = vadd.f32 %v1483_v33, %v1482_v31  ;;  %1553 = vmatprep.mubr.bf16.mxu1 %v715_v32 }
 0x185   : > { %v690_v36 = vadd.f32 %v1484_v35, %v2063_v13  ;;  %v707_v37 = vmax.f32 %v687_v34, 0.0  ;;  %v1697_v13 = vld [vmem:[%s2273_s5 + $0x18] sm:$0xff]  }
 0x186   : > { %1563 = vmatprep.subr.bf16.mxu1 %v1697_v13 }
 0x187   : > { %v708_v38 = vmax.f32 %v690_v36, 0.0  ;;  %1564 = vmatpush3.bf16.msra.mxu1 %v1697_v13 }
 0x188   : > { %1605 = vmatprep.subr.bf16.mxu1 %v2049_v9 }
 0x189   : > { %v716_v39 = vpack.c.bf16 %v708_v38, %v707_v37  ;;  %v2142_v37 = vld [vmem:[%s2274_s6] ss:$0 sm:$0xff] }
 0x18a   : > { %v2147_v38 = vld [vmem:[%s2276_s8] ss:$0 sm:$0xff] }
 0x18b   : > { %1554 = vmatmul.mubr.bf16.gmra.mrb[12].mxu1 %v716_v39 }
 0x22e   : > { %v1543_v44 = vpop.f32.mrb[0].mxu1 }
 0x22f   : > { %v831_v45 = vadd.f32 %v1543_v44, %v2100_v43  ;;  %v822_v46 = vpop.f32.mrb[1].mxu1 }
 0x230   : > { %v823_v47 = vadd.f32 %v2100_v43, %v822_v46  ;;  %v1544_v48 = vpop.f32.mrb[2].mxu1 }
 0x231   : > { %v834_v49 = vadd.f32 %v1544_v48, %v2100_v43  ;;  %v825_v50 = vpop.f32.mrb[3].mxu1  ;;  %v887_v52 = vmax.f32 %v831_v45, 0.0 }
 0x232   : > { %v826_v51 = vadd.f32 %v2100_v43, %v825_v50  ;;  %v885_v54 = vmax.f32 %v823_v47, 0.0 }
 0x233   : > { %v888_v53 = vmax.f32 %v834_v49, 0.0 }
 0x234   : > { %v886_v55 = vmax.f32 %v826_v51, 0.0 }
 0x235   : > { %v902_v56 = vpack.c.bf16 %v888_v53, %v887_v52 }
 0x236   : > { %v901_v57 = vpack.c.bf16 %v886_v55, %v885_v54 }
 0x238   : > { %1565 = vmatprep.mubr.msk.bf16.mxu1 %vm948_vm0, %v901_v57  ;;  %1589 = vmatprep.mubr.msk.bf16.mxu0 %vm948_vm0, %v901_v57 }
 0x239   : > { %1566 = vmatmul.mubr.msk.bf16.vlgmr.msra.gmra.mrb[16].mxu1 %vm948_vm0, %v902_v56  ;;  %1590 = vmatmul.mubr.msk.bf16.vlgmr.msra.gmra.mrb[32].mxu0 %vm948_vm0, %v902_v56 }
 0x23a   : > { %1609 = vmatpush3.bf16.msra.mxu1 %v2049_v9 }
 0x23b   : > { %1606 = vmatprep.subr.bf16.mxu1 %v2054_v10 }
 0x23e   : > { %v1547_v58 = vpop.f32.mrb[4].mxu1  ;;  %1610 = vmatpush3.bf16.msra.mxu1 %v2054_v10 }
 0x23f   : > { %v847_v59 = vadd.f32 %v1547_v58, %v2100_v43  ;;  %v838_v60 = vpop.f32.mrb[5].mxu1  ;;  %1607 = vmatprep.subr.bf16.mxu1 %v1696_v41 }
 0x240   : > { %v839_v61 = vadd.f32 %v2100_v43, %v838_v60  ;;  %v1548_v62 = vpop.f32.mrb[6].mxu1 }
 0x241   : > { %v850_v63 = vadd.f32 %v1548_v62, %v2100_v43  ;;  %v841_v0 = vpop.f32.mrb[7].mxu1  ;;  %v891_v2 = vmax.f32 %v847_v59, 0.0 }
 0x242   : > { %v842_v1 = vadd.f32 %v2100_v43, %v841_v0  ;;  %1611 = vmatpush3.bf16.msra.mxu1 %v1696_v41  ;;  %v889_v3 = vmax.f32 %v839_v61, 0.0 }
 0x243   : > { %v892_v9 = vmax.f32 %v850_v63, 0.0  ;;  %1608 = vmatprep.subr.bf16.mxu1 %v1698_v42 }
 0x244   : > { %v890_v4 = vmax.f32 %v842_v1, 0.0 }
 0x245   : > { %v904_v5 = vpack.c.bf16 %v892_v9, %v891_v2 }
 0x246   : > { %v903_v10 = vpack.c.bf16 %v890_v4, %v889_v3  ;;  %1612 = vmatpush3.bf16.msra.mxu1 %v1698_v42 }
 0x248   : > { %1569 = vmatprep.mubr.msk.bf16.mxu1 %vm948_vm0, %v903_v10  ;;  %1593 = vmatprep.mubr.msk.bf16.mxu0 %vm948_vm0, %v903_v10 }
 0x249   : > { %1570 = vmatmul.mubr.msk.bf16.gmra.mrb[20].mxu1 %vm948_vm0, %v904_v5  ;;  %1594 = vmatmul.mubr.msk.bf16.gmra.mrb[36].mxu0 %vm948_vm0, %v904_v5 }
 0x24e   : > { %v1551_v6 = vpop.f32.mrb[8].mxu1 }
 0x24f   : > { %v863_v7 = vadd.f32 %v1551_v6, %v2100_v43  ;;  %v854_v8 = vpop.f32.mrb[9].mxu1 }
 0x250   : > { %v855_v11 = vadd.f32 %v2100_v43, %v854_v8  ;;  %v1552_v12 = vpop.f32.mrb[10].mxu1 }
 0x251   : > { %v866_v14 = vadd.f32 %v1552_v12, %v2100_v43  ;;  %v857_v15 = vpop.f32.mrb[11].mxu1  ;;  %v895_v17 = vmax.f32 %v863_v7, 0.0 }
 0x252   : > { %v858_v16 = vadd.f32 %v2100_v43, %v857_v15  ;;  %v893_v19 = vmax.f32 %v855_v11, 0.0 }
 0x253   : > { %v896_v18 = vmax.f32 %v866_v14, 0.0 }
 0x254   : > { %v894_v20 = vmax.f32 %v858_v16, 0.0 }
 0x255   : > { %v906_v21 = vpack.c.bf16 %v896_v18, %v895_v17 }
 0x256   : > { %v905_v22 = vpack.c.bf16 %v894_v20, %v893_v19 }
 0x258   : > { %1573 = vmatprep.mubr.msk.bf16.mxu1 %vm948_vm0, %v905_v22 }
 0x259   : > { %1574 = vmatmul.mubr.msk.bf16.gmra.mrb[24].mxu1 %vm948_vm0, %v906_v21 }
 0x25e   : > { %v1555_v23 = vpop.f32.mrb[12].mxu1 }
 0x25f   : > { %v879_v24 = vadd.f32 %v1555_v23, %v2100_v43  ;;  %v870_v25 = vpop.f32.mrb[13].mxu1 }
 0x260   : > { %v871_v26 = vadd.f32 %v2100_v43, %v870_v25  ;;  %v1556_v27 = vpop.f32.mrb[14].mxu1 }
 0x261   : > { %v882_v28 = vadd.f32 %v1556_v27, %v2100_v43  ;;  %v873_v29 = vpop.f32.mrb[15].mxu1  ;;  %v899_v31 = vmax.f32 %v879_v24, 0.0 }
 0x262   : > { %v874_v30 = vadd.f32 %v2100_v43, %v873_v29  ;;  %v897_v33 = vmax.f32 %v871_v26, 0.0 }
 0x263   : > { %v900_v32 = vmax.f32 %v882_v28, 0.0 }
 0x264   : > { %v898_v34 = vmax.f32 %v874_v30, 0.0 }
 0x265   : > { %v908_v35 = vpack.c.bf16 %v900_v32, %v899_v31 }
 0x266   : > { %v907_v36 = vpack.c.bf16 %v898_v34, %v897_v33 }
 0x268   : > { %1577 = vmatprep.mubr.msk.bf16.mxu1 %vm948_vm0, %v907_v36 }
 0x269   : > { %1578 = vmatmul.mubr.msk.bf16.gmra.mrb[28].mxu1 %vm948_vm0, %v908_v35 }
 0x26a   : > { %1597 = vmatprep.mubr.msk.bf16.mxu1 %vm948_vm0, %v905_v22 }
 0x271   : > { %1598 = vmatmul.mubr.msk.bf16.vlgmr.msra.gmra.mrb[32].mxu1 %vm948_vm0, %v906_v21 }
 0x272   : > { %1601 = vmatprep.mubr.msk.bf16.mxu1 %vm948_vm0, %v907_v36 }
 0x279   : > { %1602 = vmatmul.mubr.msk.bf16.gmra.mrb[36].mxu1 %vm948_vm0, %v908_v35 }
 0x30c   : > { %v1567_v39 = vpop.f32.mrb[16].mxu1  ;;  %v1591_v40 = vpop.f32.mrb[32].mxu0 }
 0x30d   : > { %v1016_v41 = vadd.f32 %v1567_v39, %v2142_v37  ;;  %v1168_v13 = vadd.f32 %v1591_v40, %v2147_v38  ;;  %v1007_v42 = vpop.f32.mrb[17].mxu1  ;;  %v1159_v43 = vpop.f32.mrb[33].mxu0 }
 0x30e   : > { %v1008_v44 = vadd.f32 %v2142_v37, %v1007_v42  ;;  %v1160_v45 = vadd.f32 %v2147_v38, %v1159_v43  ;;  %v1568_v46 = vpop.f32.mrb[18].mxu1  ;;  %v1592_v47 = vpop.f32.mrb[34].mxu0 }
 0x30f   : > { %1072 = vst.msk [vmem:[%s2152_s27 + $0x10] sm:$0xff] %vm948_vm0, %v1016_v41  ;;  %1224 = vst.msk [vmem:[%s2157_s28 + $0x10] sm:$0xff] %vm948_vm0, %v1168_v13  ;;  %v1019_v48 = vadd.f32 %v1568_v46, %v2142_v37  ;;  %v1171_v49 = vadd.f32 %v1592_v47, %v2147_v38  ;;  %v1010_v50 = vpop.f32.mrb[19].mxu1  ;;  %v1162_v51 = vpop.f32.mrb[35].mxu0 }
 0x310   : > { %1070 = vst.msk [vmem:[%s2152_s27] sm:$0xff] %vm948_vm0, %v1008_v44  ;;  %1222 = vst.msk [vmem:[%s2157_s28] sm:$0xff] %vm948_vm0, %v1160_v45  ;;  %v1011_v52 = vadd.f32 %v2142_v37, %v1010_v50  ;;  %v1163_v53 = vadd.f32 %v2147_v38, %v1162_v51 }
 0x311   : > { %1073 = vst.msk [vmem:[%s2152_s27 + $0x18] sm:$0xff] %vm948_vm0, %v1019_v48  ;;  %1225 = vst.msk [vmem:[%s2157_s28 + $0x18] sm:$0xff] %vm948_vm0, %v1171_v49 }
 0x312   : > { %1071 = vst.msk [vmem:[%s2152_s27 + $0x8] sm:$0xff] %vm948_vm0, %v1011_v52  ;;  %1223 = vst.msk [vmem:[%s2157_s28 + $0x8] sm:$0xff] %vm948_vm0, %v1163_v53 }
 0x31c   : > { %v1571_v54 = vpop.f32.mrb[20].mxu1  ;;  %v1595_v55 = vpop.f32.mrb[36].mxu0 }
 0x31d   : > { %v1032_v56 = vadd.f32 %v1571_v54, %v2142_v37  ;;  %v1184_v57 = vadd.f32 %v1595_v55, %v2147_v38  ;;  %v1023_v58 = vpop.f32.mrb[21].mxu1  ;;  %v1175_v59 = vpop.f32.mrb[37].mxu0 }
 0x31e   : > { %v1024_v60 = vadd.f32 %v2142_v37, %v1023_v58  ;;  %v1176_v61 = vadd.f32 %v2147_v38, %v1175_v59  ;;  %v1572_v62 = vpop.f32.mrb[22].mxu1  ;;  %v1596_v63 = vpop.f32.mrb[38].mxu0 }
 0x31f   : > { %1076 = vst.msk [vmem:[%s2152_s27 + $0x30] sm:$0xff] %vm948_vm0, %v1032_v56  ;;  %1228 = vst.msk [vmem:[%s2157_s28 + $0x30] sm:$0xff] %vm948_vm0, %v1184_v57  ;;  %v1035_v0 = vadd.f32 %v1572_v62, %v2142_v37  ;;  %v1187_v1 = vadd.f32 %v1596_v63, %v2147_v38  ;;  %v1026_v2 = vpop.f32.mrb[23].mxu1  ;;  %v1178_v9 = vpop.f32.mrb[39].mxu0 }
 0x320   : > { %1074 = vst.msk [vmem:[%s2152_s27 + $0x20] sm:$0xff] %vm948_vm0, %v1024_v60  ;;  %1226 = vst.msk [vmem:[%s2157_s28 + $0x20] sm:$0xff] %vm948_vm0, %v1176_v61  ;;  %v1027_v3 = vadd.f32 %v2142_v37, %v1026_v2  ;;  %v1179_v4 = vadd.f32 %v2147_v38, %v1178_v9 }
 0x321   : > { %1077 = vst.msk [vmem:[%s2152_s27 + $0x38] sm:$0xff] %vm948_vm0, %v1035_v0  ;;  %1229 = vst.msk [vmem:[%s2157_s28 + $0x38] sm:$0xff] %vm948_vm0, %v1187_v1 }
 0x322   : > { %1075 = vst.msk [vmem:[%s2152_s27 + $0x28] sm:$0xff] %vm948_vm0, %v1027_v3  ;;  %1227 = vst.msk [vmem:[%s2157_s28 + $0x28] sm:$0xff] %vm948_vm0, %v1179_v4 }
 0x32c   : > { %v1575_v5 = vpop.f32.mrb[24].mxu1 }
 0x32d   : > { %v1048_v10 = vadd.f32 %v1575_v5, %v2142_v37  ;;  %v1039_v6 = vpop.f32.mrb[25].mxu1 }
 0x32e   : > { %v1040_v7 = vadd.f32 %v2142_v37, %v1039_v6  ;;  %v1576_v8 = vpop.f32.mrb[26].mxu1 }
 0x32f   : > { %1080 = vst.msk [vmem:[%s2152_s27 + $0x50] sm:$0xff] %vm948_vm0, %v1048_v10  ;;  %v1051_v11 = vadd.f32 %v1576_v8, %v2142_v37  ;;  %v1042_v12 = vpop.f32.mrb[27].mxu1 }
 0x330   : > { %1078 = vst.msk [vmem:[%s2152_s27 + $0x40] sm:$0xff] %vm948_vm0, %v1040_v7  ;;  %v1043_v14 = vadd.f32 %v2142_v37, %v1042_v12 }
 0x331   : > { %1081 = vst.msk [vmem:[%s2152_s27 + $0x58] sm:$0xff] %vm948_vm0, %v1051_v11 }
 0x332   : > { %1079 = vst.msk [vmem:[%s2152_s27 + $0x48] sm:$0xff] %vm948_vm0, %v1043_v14 }
 0x33c   : > { %v1579_v15 = vpop.f32.mrb[28].mxu1 }
 0x33d   : > { %v1064_v16 = vadd.f32 %v1579_v15, %v2142_v37  ;;  %v1055_v17 = vpop.f32.mrb[29].mxu1 }
 0x33e   : > { %v1056_v18 = vadd.f32 %v2142_v37, %v1055_v17  ;;  %v1580_v19 = vpop.f32.mrb[30].mxu1 }
 0x33f   : > { %1084 = vst.msk [vmem:[%s2152_s27 + $0x70] sm:$0xff] %vm948_vm0, %v1064_v16  ;;  %v1067_v20 = vadd.f32 %v1580_v19, %v2142_v37  ;;  %v1058_v21 = vpop.f32.mrb[31].mxu1 }
 0x340   : > { %1082 = vst.msk [vmem:[%s2152_s27 + $0x60] sm:$0xff] %vm948_vm0, %v1056_v18  ;;  %v1059_v22 = vadd.f32 %v2142_v37, %v1058_v21 }
 0x341   : > { %1085 = vst.msk [vmem:[%s2152_s27 + $0x78] sm:$0xff] %vm948_vm0, %v1067_v20 }
 0x342   : > { %1083 = vst.msk [vmem:[%s2152_s27 + $0x68] sm:$0xff] %vm948_vm0, %v1059_v22 }
 0x344   : > { %v1599_v23 = vpop.f32.mrb[32].mxu1 }
 0x345   : > { %v1200_v24 = vadd.f32 %v1599_v23, %v2147_v38  ;;  %v1191_v25 = vpop.f32.mrb[33].mxu1 }
 0x346   : > { %v1192_v26 = vadd.f32 %v2147_v38, %v1191_v25  ;;  %v1600_v27 = vpop.f32.mrb[34].mxu1 }
 0x347   : > { %1232 = vst.msk [vmem:[%s2157_s28 + $0x50] sm:$0xff] %vm948_vm0, %v1200_v24  ;;  %v1203_v28 = vadd.f32 %v1600_v27, %v2147_v38  ;;  %v1194_v29 = vpop.f32.mrb[35].mxu1 }
 0x348   : > { %1230 = vst.msk [vmem:[%s2157_s28 + $0x40] sm:$0xff] %vm948_vm0, %v1192_v26  ;;  %v1195_v30 = vadd.f32 %v2147_v38, %v1194_v29 }
 0x349   : > { %1233 = vst.msk [vmem:[%s2157_s28 + $0x58] sm:$0xff] %vm948_vm0, %v1203_v28 }
 0x34a   : > { %1231 = vst.msk [vmem:[%s2157_s28 + $0x48] sm:$0xff] %vm948_vm0, %v1195_v30 }
 0x34c   : > { %v1603_v31 = vpop.f32.mrb[36].mxu1 }
 0x34d   : > { %v1216_v32 = vadd.f32 %v1603_v31, %v2147_v38  ;;  %v1207_v33 = vpop.f32.mrb[37].mxu1 }
 0x34e   : > { %v1208_v34 = vadd.f32 %v2147_v38, %v1207_v33  ;;  %v1604_v35 = vpop.f32.mrb[38].mxu1 }
 0x34f   : > { %1236 = vst.msk [vmem:[%s2157_s28 + $0x70] sm:$0xff] %vm948_vm0, %v1216_v32  ;;  %v1219_v36 = vadd.f32 %v1604_v35, %v2147_v38  ;;  %v1210_v37 = vpop.f32.mrb[39].mxu1 }
 0x350   : > { %1234 = vst.msk [vmem:[%s2157_s28 + $0x60] sm:$0xff] %vm948_vm0, %v1208_v34  ;;  %v1211_v39 = vadd.f32 %v2147_v38, %v1210_v37 }
 0x351   : > { %1237 = vst.msk [vmem:[%s2157_s28 + $0x78] sm:$0xff] %vm948_vm0, %v1219_v36 }
 0x352   : > { %1235 = vst.msk [vmem:[%s2157_s28 + $0x68] sm:$0xff] %vm948_vm0, %v1211_v39 }
 0x353 PF: > { %s2298_s16 = sld [smem:[#allocation8_spill]]  ;;  %s2299_s13 = smov %s1787_s14 }
 0x354   : > { %s2300_s14 = smov %s1791_s15  ;;  %s2301_s15 = smov %s1931_s11 }
 0x359   : > { %p22_p6 = scmp.ge.s32.totalorder %s2298_s16, 4  }
 0x35b   :  { %24 = sbr.rel (!%p22_p6) target bundleno = 6 (0x6), region = 112 }
 0x362   :  { %1277 = vsyncpa [#allocation3], 1 }
 0x363   :  { %1279 = vsyncpa [#allocation3 + $0x1], 1 }
 0x364   :  { %1280 = vsyncpa [#allocation5], 1 }

</bundles_post_ra>
